<compile_context>
chip_gen: v6e
topology: v6e:2x2x1
jax: 0.10.0
libtpu: 0.0.40
codegen_flags: <defaults>
</compile_context>

<pallas_src>
import functools
from math import sqrt

import jax
import jax.numpy as jnp
from jax.experimental import pallas as pl
from jax.experimental.pallas import tpu as pltpu


def _mha_kernel(x_ref, w_ref, o_ref, *, num_heads, head_dim):
    H, hd = num_heads, head_dim

    w = w_ref[...]                                   # (H, D_in, 3*hd), bf16
    x = x_ref[...].astype(w.dtype)                   # (S, D_in)  (Squeezed batch dim)
    xb = jnp.broadcast_to(x, (H,) + x.shape)         # (H, S, D_in) -- cheap leading-dim bcast

    # Fused Q/K/V projection for all heads in one batched matmul.
    # Scale (1/sqrt(dim_k)) is already folded into the Q slab of w.
    qkv = jnp.einsum("hsd,hde->hse", xb, w,
                     preferred_element_type=jnp.float32)         # (H, S, 3*hd) f32
    q = qkv[..., :hd].astype(w.dtype)                            # (H, S, hd) bf16
    k = qkv[..., hd:2 * hd].astype(w.dtype)
    v = qkv[..., 2 * hd:].astype(w.dtype)

    # Head-batched QK^T (no transposes: contract the last dims directly).
    s = jnp.einsum("hqd,hkd->hqk", q, k,
                   preferred_element_type=jnp.float32)           # (H, S, S) f32

    # Numerically-stable softmax over keys (dim=3 in the torch reference).
    s = s - jnp.max(s, axis=-1, keepdims=True)
    p = jnp.exp(s)
    denom = jnp.sum(p, axis=-1, keepdims=True)
    p = p * pl.reciprocal(denom, approx=True)                    # EUP, not VALU divide

    # Head-batched P @ V.
    o = jnp.einsum("hqk,hkd->hqd", p.astype(w.dtype), v,
                   preferred_element_type=jnp.float32)           # (H, S, hd) f32

    # torch.cat(torch.split(out, 1, dim=0), dim=3).squeeze(0): heads concatenated
    # in order along the feature dim -> one (S, H*hd) store.
    # TODO(synk): at realistic dim_v this store should be made lane-dense (>=128
    # lanes); at dim_v=32 every layout keeps it a masked store, so we keep it simple.
    o_ref[...] = jnp.concatenate([o[h] for h in range(H)], axis=-1).astype(o_ref.dtype)


def prepare_mha_params(wq, wk, wv, num_heads, compute_dtype=jnp.bfloat16):
    """One-time host-side weight prep: fuse/transpose/scale the torch-layout weights.

    Returns a (H, D_in, 3*head_dim) tensor laid out so the kernel needs no
    transposes: per head h, columns [0:hd] are (Wq_h^T * 1/sqrt(dim_k)),
    [hd:2hd] are Wk_h^T, [2hd:3hd] are Wv_h^T.
    """
    dim_k, d_in = wq.shape
    dim_v = wv.shape[0]
    # The reference module's split/stack/cat only makes sense when dim_v == dim_k.
    assert dim_v == dim_k, "reference semantics require dim_v == dim_k"
    assert dim_k % num_heads == 0
    hd = dim_k // num_heads
    scale = 1.0 / sqrt(dim_k)  # full dim_k, NOT head_dim (matches the PyTorch module)

    wq_h = (wq * scale).reshape(num_heads, hd, d_in).transpose(0, 2, 1)  # (H, D_in, hd)
    wk_h = wk.reshape(num_heads, hd, d_in).transpose(0, 2, 1)
    wv_h = wv.reshape(num_heads, hd, d_in).transpose(0, 2, 1)
    w_fused = jnp.concatenate([wq_h, wk_h, wv_h], axis=-1)               # (H, D_in, 3*hd)
    return w_fused.astype(compute_dtype)


def multihead_attention(x, w_fused, num_heads):
    B, S, D_in = x.shape
    H, _, three_hd = w_fused.shape
    assert H == num_heads
    hd = three_hd // 3
    dim_v = H * hd

    kernel = functools.partial(_mha_kernel, num_heads=num_heads, head_dim=hd)
    return pl.pallas_call(
        kernel,
        out_shape=jax.ShapeDtypeStruct((B, S, dim_v), x.dtype),
        grid_spec=pltpu.PrefetchScalarGridSpec(
            num_scalar_prefetch=0,
            grid=(B,),
            in_specs=[
                pl.BlockSpec((pl.Squeezed(), S, D_in), lambda b: (b, 0, 0)),
                pl.BlockSpec((H, D_in, three_hd), lambda b: (0, 0, 0)),
            ],
            out_specs=pl.BlockSpec((pl.Squeezed(), S, dim_v), lambda b: (b, 0, 0)),
        ),
        # "parallel" so v7x's two TensorCores each take one batch element;
        # the extra grid step costs ~0.35us on single-TC v5e/v6e (negligible).
        compiler_params=pltpu.CompilerParams(dimension_semantics=("parallel",)),
    )(x, w_fused)


def _reference(x, wq, wk, wv, num_heads):
    """Pure-JAX (f32) restatement of the PyTorch forward, for verification."""
    q = x @ wq.T
    k = x @ wk.T
    v = x @ wv.T
    dim_k = wq.shape[0]
    qh = jnp.stack(jnp.split(q, num_heads, axis=2), axis=0)   # (H, B, S, hd)
    kh = jnp.stack(jnp.split(k, num_heads, axis=2), axis=0)
    vh = jnp.stack(jnp.split(v, num_heads, axis=2), axis=0)
    scores = jnp.einsum("hbqd,hbkd->hbqk", qh, kh) / (dim_k ** 0.5)
    scores = jax.nn.softmax(scores, axis=3)
    out = jnp.einsum("hbqk,hbkd->hbqd", scores, vh)
    return jnp.concatenate([out[h] for h in range(num_heads)], axis=2)  # (B, S, H*hd)


if __name__ == "__main__":
    # Module hyper-params (small, consistent with the forward):
    batch, seq, input_dim = 2, 8, 16
    dim_k, dim_v, num_heads = 32, 32, 4

    key = jax.random.PRNGKey(0)
    kx, kq, kk, kv = jax.random.split(key, 4)

    x = jax.random.normal(kx, (batch, seq, input_dim), dtype=jnp.float32)
    # torch nn.Linear(in, out, bias=False) default init: U(-1/sqrt(in), 1/sqrt(in)), shape (out, in)
    bound = 1.0 / sqrt(input_dim)
    wq = jax.random.uniform(kq, (dim_k, input_dim), jnp.float32, -bound, bound)
    wk = jax.random.uniform(kk, (dim_k, input_dim), jnp.float32, -bound, bound)
    wv = jax.random.uniform(kv, (dim_v, input_dim), jnp.float32, -bound, bound)

    # One-time weight prep (fuse + transpose + fold scale + bf16 cast).
    w_fused = prepare_mha_params(wq, wk, wv, num_heads)

    out = multihead_attention(x, w_fused, num_heads)
    out = jax.block_until_ready(out)

    ref = _reference(x, wq, wk, wv, num_heads)
    assert out.shape == (batch, seq, dim_v)
    # bf16 MXU operands + approximate reciprocal -> relaxed tolerance vs f32 reference.
    max_err = float(jnp.max(jnp.abs(out - ref)))
    assert jnp.allclose(out, ref, atol=5e-2, rtol=5e-2), f"mismatch vs reference, max err {max_err}"

    print("KERNEL_OK")
</pallas_src>

<mosaic_0001>
module attributes {stable_mosaic.version = 11 : i64} {
  func.func @_mha_kernel(%arg0: i32, %arg1: memref<1x8x16xf32, #tpu.memory_space<vmem>>, %arg2: memref<4x16x24xbf16, #tpu.memory_space<vmem>>, %arg3: memref<1x8x32xf32, #tpu.memory_space<vmem>>) attributes {dimension_semantics = [#tpu.dimension_semantics<parallel>], iteration_bounds = array<i64: 2>, scalar_prefetch = 0 : i64, scratch_operands = 0 : i64, tpu.core_type = #tpu.core_type<tc>, window_params = [{transform_indices = @transform_0, window_bounds = array<i64: 1, 8, 16>}, {pipeline_mode = #tpu.pipeline_mode<synchronous>, transform_indices = @transform_1, window_bounds = array<i64: 4, 16, 24>}, {transform_indices = @transform_2, window_bounds = array<i64: 1, 8, 32>}]} {
    %c0 = arith.constant 0 : index
    %c0_0 = arith.constant 0 : index
    %c0_1 = arith.constant 0 : index
    %0 = vector.load %arg2[%c0, %c0_0, %c0_1] : memref<4x16x24xbf16, #tpu.memory_space<vmem>>, vector<4x16x24xbf16>
    %c0_2 = arith.constant 0 : index
    %c0_3 = arith.constant 0 : index
    %c0_4 = arith.constant 0 : index
    %1 = vector.load %arg1[%c0_2, %c0_3, %c0_4] : memref<1x8x16xf32, #tpu.memory_space<vmem>>, vector<1x8x16xf32>
    %2 = vector.shape_cast %1 : vector<1x8x16xf32> to vector<8x16xf32>
    %3 = arith.truncf %2 : vector<8x16xf32> to vector<8x16xbf16>
    %4 = vector.shape_cast %3 : vector<8x16xbf16> to vector<1x8x16xbf16>
    %5 = vector.broadcast %4 : vector<1x8x16xbf16> to vector<4x8x16xbf16>
    "tpu.trace_start"() <{level = 10 : i32, message = "hsd,hde->hse"}> : () -> ()
    %cst = arith.constant dense<0.000000e+00> : vector<4x8x24xf32>
    %6 = tpu.matmul %5, %0, %cst {dimension_numbers = #tpu.dot_dimension_numbers<[2], [1], [1], [2], [0, 0, 0, 1, 1, 2], [0], [0]>} : vector<4x8x16xbf16>, vector<4x16x24xbf16>, vector<4x8x24xf32> -> vector<4x8x24xf32>
    "tpu.trace_stop"() : () -> ()
    %7 = vector.extract_strided_slice %6 {offsets = [0, 0, 0], sizes = [4, 8, 8], strides = [1, 1, 1]} : vector<4x8x24xf32> to vector<4x8x8xf32>
    %8 = arith.truncf %7 : vector<4x8x8xf32> to vector<4x8x8xbf16>
    %9 = vector.extract_strided_slice %6 {offsets = [0, 0, 8], sizes = [4, 8, 8], strides = [1, 1, 1]} : vector<4x8x24xf32> to vector<4x8x8xf32>
    %10 = arith.truncf %9 : vector<4x8x8xf32> to vector<4x8x8xbf16>
    %11 = vector.extract_strided_slice %6 {offsets = [0, 0, 16], sizes = [4, 8, 8], strides = [1, 1, 1]} : vector<4x8x24xf32> to vector<4x8x8xf32>
    %12 = arith.truncf %11 : vector<4x8x8xf32> to vector<4x8x8xbf16>
    "tpu.trace_start"() <{level = 10 : i32, message = "hqd,hkd->hqk"}> : () -> ()
    %cst_5 = arith.constant dense<0.000000e+00> : vector<4x8x8xf32>
    %13 = tpu.matmul %8, %10, %cst_5 {dimension_numbers = #tpu.dot_dimension_numbers<[2], [2], [1], [1], [0, 0, 0, 1, 1, 1], [0], [0]>} : vector<4x8x8xbf16>, vector<4x8x8xbf16>, vector<4x8x8xf32> -> vector<4x8x8xf32>
    "tpu.trace_stop"() : () -> ()
    %cst_6 = arith.constant dense<0xFF800000> : vector<4x8xf32>
    %14 = vector.multi_reduction <maximumf>, %13, %cst_6 [2] : vector<4x8x8xf32> to vector<4x8xf32>
    %15 = vector.shape_cast %14 : vector<4x8xf32> to vector<4x8x1xf32>
    %16 = vector.broadcast %15 : vector<4x8x1xf32> to vector<4x8x8xf32>
    %17 = arith.subf %13, %16 : vector<4x8x8xf32>
    %18 = math.exp %17 : vector<4x8x8xf32>
    %cst_7 = arith.constant dense<0.000000e+00> : vector<4x8xf32>
    %19 = vector.multi_reduction <add>, %18, %cst_7 [2] : vector<4x8x8xf32> to vector<4x8xf32>
    %20 = vector.shape_cast %19 : vector<4x8xf32> to vector<4x8x1xf32>
    %21 = tpu.reciprocal %20 {approx = true} : vector<4x8x1xf32> -> vector<4x8x1xf32>
    %22 = vector.broadcast %21 : vector<4x8x1xf32> to vector<4x8x8xf32>
    %23 = arith.mulf %18, %22 : vector<4x8x8xf32>
    %24 = arith.truncf %23 : vector<4x8x8xf32> to vector<4x8x8xbf16>
    "tpu.trace_start"() <{level = 10 : i32, message = "hqk,hkd->hqd"}> : () -> ()
    %cst_8 = arith.constant dense<0.000000e+00> : vector<4x8x8xf32>
    %25 = tpu.matmul %24, %12, %cst_8 {dimension_numbers = #tpu.dot_dimension_numbers<[2], [1], [1], [2], [0, 0, 0, 1, 1, 2], [0], [0]>} : vector<4x8x8xbf16>, vector<4x8x8xbf16>, vector<4x8x8xf32> -> vector<4x8x8xf32>
    "tpu.trace_stop"() : () -> ()
    %26 = vector.extract_strided_slice %25 {offsets = [0, 0, 0], sizes = [1, 8, 8], strides = [1, 1, 1]} : vector<4x8x8xf32> to vector<1x8x8xf32>
    %27 = vector.shape_cast %26 : vector<1x8x8xf32> to vector<8x8xf32>
    %28 = vector.extract_strided_slice %25 {offsets = [1, 0, 0], sizes = [1, 8, 8], strides = [1, 1, 1]} : vector<4x8x8xf32> to vector<1x8x8xf32>
    %29 = vector.shape_cast %28 : vector<1x8x8xf32> to vector<8x8xf32>
    %30 = vector.extract_strided_slice %25 {offsets = [2, 0, 0], sizes = [1, 8, 8], strides = [1, 1, 1]} : vector<4x8x8xf32> to vector<1x8x8xf32>
    %31 = vector.shape_cast %30 : vector<1x8x8xf32> to vector<8x8xf32>
    %32 = vector.extract_strided_slice %25 {offsets = [3, 0, 0], sizes = [1, 8, 8], strides = [1, 1, 1]} : vector<4x8x8xf32> to vector<1x8x8xf32>
    %33 = vector.shape_cast %32 : vector<1x8x8xf32> to vector<8x8xf32>
    %34 = tpu.concatenate %27, %29, %31, %33 in 1 : vector<8x8xf32>, vector<8x8xf32>, vector<8x8xf32>, vector<8x8xf32> -> vector<8x32xf32>
    %c0_9 = arith.constant 0 : index
    %c0_10 = arith.constant 0 : index
    %c0_11 = arith.constant 0 : index
    %35 = vector.load %arg3[%c0_9, %c0_10, %c0_11] : memref<1x8x32xf32, #tpu.memory_space<vmem>>, vector<1x8x32xf32>
    %36 = vector.shape_cast %35 : vector<1x8x32xf32> to vector<8x32xf32>
    %37 = vector.shape_cast %34 : vector<8x32xf32> to vector<1x8x32xf32>
    tpu.vector_store %arg3[%c0_9, %c0_10, %c0_11], %37 {strides = array<i32>} : memref<1x8x32xf32, #tpu.memory_space<vmem>>, vector<1x8x32xf32>,
    return
  }
  func.func @transform_0(%arg0: i32) -> (i32, i32, i32) {
    %c0_i32 = arith.constant 0 : i32
    %c0_i32_0 = arith.constant 0 : i32
    %c0_i32_1 = arith.constant 0 : i32
    return %arg0, %c0_i32, %c0_i32_0 : i32, i32, i32
  }
  func.func @transform_1(%arg0: i32) -> (i32, i32, i32) {
    %c0_i32 = arith.constant 0 : i32
    %c0_i32_0 = arith.constant 0 : i32
    %c0_i32_1 = arith.constant 0 : i32
    %c0_i32_2 = arith.constant 0 : i32
    return %c0_i32, %c0_i32_0, %c0_i32_1 : i32, i32, i32
  }
  func.func @transform_2(%arg0: i32) -> (i32, i32, i32) {
    %c0_i32 = arith.constant 0 : i32
    %c0_i32_0 = arith.constant 0 : i32
    %c0_i32_1 = arith.constant 0 : i32
    return %arg0, %c0_i32, %c0_i32_0 : i32, i32, i32
  }
}

</mosaic_0001>

<bundles_post_ra>
// kernel: tpu_custom_call.1
= control target key start
LH: loop header
LB: loop body
LE: loop exit
PB: predicated region body
PF: predicated region fallthrough
CT: control target
= control target key end

     0   :  { %7 = vsyncpa [#allocation3], 0  ;;  %s1544_s0 = inlined_call_operand.hbm [shape: f32[2,8,16], index: 0, kind: input, shape index: {}]   ;;  %s1545_s1 = inlined_call_operand.hbm [shape: bf16[4,16,24], index: 1, kind: input, shape index: {}]   ;;  %s1546_s2 = inlined_call_operand.hbm [shape: f32[2,8,32], index: 2, kind: output, shape index: {}]  }
   0x1   :  { %9 = vsyncpa [#allocation3 + $0x1], 0 }
   0x2   :  { %10 = vsyncpa [#allocation6], 0 }
   0x3   :  { %11 = vsyncpa [#allocation4], 0 }
   0x4   :  { %13 = vsyncpa [#allocation4 + $0x1], 0  ;;  %s1290_s9 = smov 0   ;;  %s1292_s10 = smov 0  }
   0x5   :  { %s1294_s11 = smov 0   ;;  %s1296_s12 = smov 0  }
   0x6 LB: > { %s1311_s13 = sadd.s32 4294967295, %s1261_s12   ;;  %s927_s14 = sadd.s32 4294967294, %s1261_s12   ;;  %s1261_s12 = sphi %s1296_s12, %s1568_s12   ;;  %s1257_s11 = sphi %s1294_s11, %s1567_s11   ;;  %s1253_s10 = sphi %s1292_s10, %s1566_s10   ;;  %s1249_s9 = sphi %s1290_s9, %s1565_s9  }
   0x7   : > { %p39_p0 = scmp.ne.s32.totalorder %s1253_s10, %s1249_s9  ;;  %p1547_p1 = scmp.eq.s32.totalorder %s1311_s13, 0 }
   0x8   : > { %p90_p3 = scmp.eq.s32.totalorder %s927_s14, 1  ;;  %p928_p5 = scmp.ge.s32.totalorder %s1261_s12, 1 }
   0x9   : > { %p1320_p4 = por %p1547_p1, %p39_p0  ;;  %p97_p7 = scmp.lt.s32.totalorder %s1261_s12, 3 }
   0xa   : > { %p1325_p6 = por %p90_p3, %p39_p0  ;;  %s1263_s18 = smov [#allocation5]  }
   0xb   : > { %s1551_s15 = scalar_select %p1320_p4, 1, 0 }
   0xc   : > { %s1552_s16 = scalar_select %p1325_p6, 1, 0 }
   0xd   : > { %p1330_p8 = pnand %p928_p5, %p97_p7  ;;  %s109_s19 = sshll.u32 %s1263_s18, 4  ;;  %s110_s19 = int_to_ptr.vmem [resolvable:$true] %s109_s19 }
   0xe   : > { %s1344_s21 = sadd.s32 1, %s1261_s12   ;;  %s26_s22 = sadd.s32 1, %s1257_s11 }
   0xf   : > { %s1553_s17 = scalar_select %p1330_p8, 1, 0 }
  0x10   : > { %p1061_p9 = pneg %p1330_p8  ;;  %s23_s23 = ssub.s32 %s1261_s12, %s1344_s21 }
  0x11   : > { %s1150_s24 = scalar_lea.vmem %s110_s19, 512  ;;  %p1158_p5 = scmp.lt.s32.totalorder %s110_s19, %s110_s19 }
  0x12   : > { %p1339_p11 = pnand %p1061_p9, %p1547_p1  ;;  %p1151_p13 = scmp.ne.s32.totalorder %s110_s19, %s1150_s24 }
  0x13   : > { %p1159_p7 = scmp.lt.s32.totalorder %s1150_s24, %s1150_s24 }
  0x14   : > { %p1141_p12 = pneg %p1339_p11 }
  0x15   : > { %p1160_p10 = por %p1159_p7, %p1158_p5 }
  0x16   : > { %p1153_p0 = pnand %p1151_p13, %p1141_p12 }
  0x18   : > { %p1154_p3 = pneg %p1153_p0 }
  0x1a   : > { %p1161_p2 = pnand %p1160_p10, %p1154_p3 }
  0x1c   : > { %1164 = shalt.err (!%p1161_p2)
}
  0x1d   : > { %s1264_s25 = smov 64   ;;  %s1265_s26 = smov 4  }
  0x1e   : > { %1064 = dma.hbm_to_vmem [thread:$0]  (!%p1339_p11), %s1545_s1, 512, %s110_s19, [#allocation6], %s1264_s25, %s1264_s25, %s1265_s26  }
  0x1f   : > { %p24_p9 = scmp.eq.s32.totalorder %s23_s23, 0  ;;  %p33_p12 = scmp.ne.s32.totalorder %s1257_s11, %s1253_s10 }
  0x20   : > { %p34_p10 = scmp.eq.s32.totalorder %s1261_s12, 0  ;;  %p1074_p2 = scmp.lt.s32.totalorder %s1261_s12, 2 }
  0x21   : > { %s1361_s29 = scalar_select %p24_p9, %s1257_s11, %s26_s22  }
  0x22   : > { %p35_p13 = por %p34_p10, %p33_p12  ;;  %p1555_p0 = scmp.eq.s32.totalorder %s1311_s13, 1 }
  0x23   : > { %s123_s3 = sand.u32 1, %s1257_s11   ;;  %s932_s4 = sshll.u32 %s1261_s12, 7 }
  0x24   : > { %p1365_p3 = por %p1555_p0, %p33_p12  ;;  %s931_s5 = sshll.u32 %s123_s3, 3 }
  0x25   : > { %s1374_s8 = scalar_lea.hbm %s1544_s0, %s932_s4  ;;  %s127_s14 = scalar_lea.vmem [#allocation2], %s931_s5 }
  0x26   : > { %s1556_s30 = scalar_select %p1365_p3, 1, 0 }
  0x27   : > { %s134_s18 = sshll.u32 %s127_s14, 4  ;;  %p1376_p11 = pnand %p1074_p2, %p35_p13  ;;  %s135_s18 = int_to_ptr.vmem [resolvable:$true] %s134_s18 }
  0x28   : > { %s124_s20 = scalar_lea.sflag [#allocation3], %s123_s3  ;;  %s1165_s22 = scalar_lea.hbm %s1374_s8, 128 }
  0x29   : > { %p1166_p5 = scmp.ne.s32.totalorder %s1374_s8, %s1165_s22  ;;  %p1167_p7 = pneg %p1376_p11 }
  0x2a   : > { %s1170_s25 = scalar_lea.hbm %s1544_s0, 256  ;;  %p1171_p10 = scmp.lt.s32.totalorder %s1374_s8, %s1544_s0 }
  0x2b   : > { %p1168_p9 = pnand %p1167_p7, %p1166_p5  ;;  %p1172_p2 = scmp.lt.s32.totalorder %s1170_s25, %s1165_s22 }
  0x2d   : > { %p1169_p12 = pneg %p1168_p9  ;;  %p1173_p13 = por %p1172_p2, %p1171_p10 }
  0x2f   : > { %p1174_p0 = pnand %p1173_p13, %p1169_p12 }
  0x31   : > { %1177 = shalt.err (!%p1174_p0)
}
  0x32   : > { %s1178_s28 = scalar_lea.vmem %s135_s18, 128  ;;  %s1266_s3 = smov [#allocation2]  }
  0x33   : > { %p1179_p1 = scmp.ne.s32.totalorder %s135_s18, %s1178_s28  ;;  %s1183_s4 = sshll.u32 %s1266_s3, 4  ;;  %s1184_s4 = int_to_ptr.vmem [resolvable:$false] %s1183_s4 }
  0x34   : > { %s1185_s5 = scalar_lea.vmem %s1184_s4, 256  ;;  %p1186_p5 = scmp.lt.s32.totalorder %s135_s18, %s1184_s4 }
  0x35   : > { %p1181_p6 = pnand %p1179_p1, %p1167_p7  ;;  %p1187_p9 = scmp.lt.s32.totalorder %s1185_s5, %s1178_s28 }
  0x37   : > { %p1182_p3 = pneg %p1181_p6  ;;  %p1188_p4 = por %p1187_p9, %p1186_p5 }
  0x39   : > { %p1189_p8 = pnand %p1188_p4, %p1182_p3 }
  0x3b   : > { %1192 = shalt.err (!%p1189_p8)
}
  0x3c   : > { %1068 = dma.hbm_to_vmem [thread:$0]  (!%p1376_p11), %s1374_s8, 128, %s135_s18, %s124_s20  }
  0x3d   : > { %p1558_p12 = scmp.ne.s32.totalorder %s1553_s17, 0 }
  0x3e   : > { %s1397_s6 = sand.u32 (!%p1558_p12), 1, %s1253_s10   ;;  %p1559_p1 = scmp.ne.s32.totalorder (!%p1558_p12), %s1551_s15, 0 }
  0x3f   : > { %143 = sbr.rel (%p1558_p12) target bundleno = 1237 (0x4d5), region = 28  ;;  %s934_s7 = sshll.u32 (!%p1558_p12), %s1397_s6, 3 }
  0x40   : > { %s146_s14 = scalar_lea.sflag (!%p1558_p12), [#allocation3], %s1397_s6  ;;  %s149_s22 = scalar_lea.vmem (!%p1558_p12), [#allocation2], %s934_s7 }
  0x44   : > { %1236 = dma.done.wait (%p1559_p1), %s146_s14, 128  }
  0x45   : > { %1238 = vsyncadd (%p1559_p1), %s146_s14, 4294967168  ;;  %p1560_p4 = scmp.eq.s32.totalorder %s1311_s13, 0 }
  0x47   : > { %1240 = dma.done.wait (%p1560_p4), [#allocation6], 512   ;;  %p1561_p6 = pmov %p1560_p4 }
  0x48   : > { %v1267_v0 = vmov 0.0   ;;  %vm1268_vm0 = vmmov 0   ;;  %v1119_v1 = vld [vmem:[#allocation5] sm:$0xff]   ;;  %v1120_v2 = vld [vmem:[#allocation5 + $0x8] sm:$0xff]   ;;  %v183_v3 = vld [vmem:[%s149_s22] sm:$0xff]  ;;  %vm191_vm1 = vcmask 130048  }
  0x49   : > { %1242 = vsyncadd (%p1561_p6), [#allocation6], 4294966784  ;;  %981 = vmatprep.subr.bf16.mxu0 %v1267_v0  ;;  %987 = vmatprep.subr.bf16.mxu1 %v1267_v0  ;;  %v184_v4 = vpack.c.bf16 %v183_v3, %v183_v3  ;;  %v1121_v5 = vld [vmem:[#allocation5 + $0x10] sm:$0xff]   ;;  %v1122_v6 = vld [vmem:[#allocation5 + $0x18] sm:$0xff]   ;;  %s1269_s15 = smov 120   ;;  %vm380_vm2 = vcmask 64512  }
  0x4a   : > { %983 = vmatprep.mubr.msk.bf16.mxu0 %vm1268_vm0, %v1267_v0  ;;  %989 = vmatprep.mubr.msk.bf16.mxu1 %vm1268_vm0, %v1267_v0  ;;  %s1270_s17 = smov 112   ;;  %vm627_vm3 = vcmask 1043456   ;;  %s1271_s8 = smov 8   ;;  %vm829_vm4 = vcmask 195584   ;;  %vm831_vm5 = vcmask 261120  }
  0x4b   : > { %982 = vmatpush3.bf16.msra.mxu0 %v1119_v1  ;;  %988 = vmatpush3.bf16.msra.mxu1 %v1120_v2  ;;  %s1272_s18 = smov 16   ;;  %s1273_s19 = smov 24  }
  0x4c   : > { %993 = vmatprep.subr.bf16.mxu0 %v1267_v0  ;;  %999 = vmatprep.subr.bf16.mxu1 %v1267_v0  ;;  %s954_s20 = sshll.u32 %s1311_s13, 7  ;;  %s173_s23 = scalar_lea.vmem [#allocation7], %s934_s7 }
  0x4d   : > { %s847_s24 = sshll.u32 %s173_s23, 4  ;;  %s1507_s27 = scalar_lea.hbm %s1546_s2, %s954_s20  ;;  %s848_s24 = int_to_ptr.vmem [resolvable:$true] %s847_s24 }
  0x4e   : > { %984 = vmatmul.mubr.msk.bf16.vlgmr.msra.gmra.mxu0 %vm191_vm1, %v184_v4  ;;  %990 = vmatmul.mubr.msk.bf16.vlgmr.msra.gmra.mxu1 %vm191_vm1, %v184_v4  ;;  %s834_s28 = scalar_lea.sflag [#allocation4], %s1397_s6  ;;  %s1193_s13 = scalar_lea.vmem %s848_s24, 128 }
  0x4f   : > { %994 = vmatpush3.bf16.msra.mxu0 %v1121_v5  ;;  %1000 = vmatpush3.bf16.msra.mxu1 %v1122_v6  ;;  %p1194_p8 = scmp.ne.s32.totalorder %s848_s24, %s1193_s13  ;;  %p1562_p3 = scmp.ne.s32.totalorder %s1556_s30, 0 }
  0x50   : > { %995 = vmatprep.mubr.msk.bf16.mxu0 %vm1268_vm0, %v1267_v0  ;;  %1001 = vmatprep.mubr.msk.bf16.mxu1 %vm1268_vm0, %v1267_v0  ;;  %s1274_s3 = smov [#allocation7]  }
  0x51   : > { %1005 = vmatprep.subr.bf16.mxu0 %v1267_v0  ;;  %1011 = vmatprep.subr.bf16.mxu1 %v1267_v0  ;;  %p1195_p11 = pnand %p1194_p8, %p1562_p3  ;;  %s1197_s4 = sshll.u32 %s1274_s3, 4  ;;  %s1198_s4 = int_to_ptr.vmem [resolvable:$false] %s1197_s4 }
  0x52   : > { %s1199_s5 = scalar_lea.vmem %s1198_s4, 256  ;;  %p1200_p10 = scmp.lt.s32.totalorder %s848_s24, %s1198_s4 }
  0x53   : > { %p1196_p7 = pneg %p1195_p11  ;;  %p1201_p2 = scmp.lt.s32.totalorder %s1199_s5, %s1193_s13 }
  0x55   : > { %p1202_p13 = por %p1201_p2, %p1200_p10 }
  0x56   : > { %996 = vmatmul.mubr.msk.bf16.vlgmr.msra.gmra.mxu0 %vm191_vm1, %v184_v4  ;;  %1002 = vmatmul.mubr.msk.bf16.vlgmr.msra.gmra.mxu1 %vm191_vm1, %v184_v4 }
  0x57   : > { %1007 = vmatprep.mubr.msk.bf16.mxu0 %vm1268_vm0, %v1267_v0  ;;  %1013 = vmatprep.mubr.msk.bf16.mxu1 %vm1268_vm0, %v1267_v0  ;;  %p1203_p0 = pnand %p1202_p13, %p1196_p7 }
 0x10e   : > { %v229_v7 = vpop.f32.mrf.mxu0  ;;  %v275_v9 = vpop.f32.mrf.mxu1 }
 0x10f   : > { %v1433_v8 = vpack.c.bf16 %v229_v7, %v229_v7  ;;  %v1435_v11 = vpack.c.bf16 %v275_v9, %v275_v9 }
 0x110   : > { %v985_v10 = vpop.f32.mrf.mxu0  ;;  %v991_v12 = vpop.f32.mrf.mxu1 }
 0x111   : > { %378 = vrot.lane.b32.xlu0 %v1433_v8, %s1269_s15 }
 0x112   : > { %v232_v13 = vpop.f32.mrf.mxu0  ;;  %v278_v14 = vpop.f32.mrf.mxu1 }
 0x114   : > { %v986_v15 = vpop.f32.mrf.mxu0  ;;  %v992_v16 = vpop.f32.mrf.mxu1 }
 0x115   : > { %428 = vrot.lane.b32.xlu0 %v1435_v11, %s1269_s15 }
 0x116   : > { %v321_v17 = vpop.f32.mrf.mxu0  ;;  %v367_v19 = vpop.f32.mrf.mxu1 }
 0x117   : > { %v1439_v18 = vpack.c.bf16 %v321_v17, %v321_v17  ;;  %v1441_v21 = vpack.c.bf16 %v367_v19, %v367_v19 }
 0x118   : > { %v997_v20 = vpop.f32.mrf.mxu0  ;;  %v1003_v22 = vpop.f32.mrf.mxu1 }
 0x119   : > { %477 = vrot.lane.b32.xlu1 %v1439_v18, %s1269_s15 }
 0x11a   : > { %v324_v23 = vpop.f32.mrf.mxu0  ;;  %v370_v24 = vpop.f32.mrf.mxu1 }
 0x11c   : > { %v998_v25 = vpop.f32.mrf.mxu0  ;;  %v1004_v26 = vpop.f32.mrf.mxu1 }
 0x11d   : > { %526 = vrot.lane.b32.xlu1 %v1441_v21, %s1269_s15 }
 0x183   : > { %v379_v27 = vpop.permute.xlu0 %378 }
 0x184   : > { %v385_v28 = vsel %vm380_vm2, %v379_v27, 0 }
 0x185   : > { %1006 = vmatpush3.bf16.xpose.msra.mxu0 %v385_v28 }
 0x186   : > { %1017 = vmatprep.subr.bf16.mxu0 %v1267_v0 }
 0x187   : > { %v429_v29 = vpop.permute.xlu0 %428 }
 0x188   : > { %v434_v30 = vsel %vm380_vm2, %v429_v29, 0 }
 0x189   : > { %1012 = vmatpush3.bf16.xpose.msra.mxu1 %v434_v30 }
 0x18a   : > { %1023 = vmatprep.subr.bf16.mxu1 %v1267_v0 }
 0x18b   : > { %v478_v31 = vpop.permute.xlu1 %477 }
 0x18c   : > { %v483_v32 = vsel %vm380_vm2, %v478_v31, 0  ;;  %1008 = vmatmul.mubr.msk.bf16.vlgmr.msra.gmra.mxu0 %vm380_vm2, %v1433_v8 }
 0x18d   : > { %1018 = vmatpush3.bf16.xpose.msra.mxu0 %v483_v32  ;;  %1019 = vmatprep.mubr.msk.bf16.mxu0 %vm1268_vm0, %v1267_v0 }
 0x18e   : > { %1029 = vmatprep.subr.bf16.mxu0 %v1267_v0 }
 0x18f   : > { %v527_v33 = vpop.permute.xlu1 %526 }
 0x190   : > { %v532_v34 = vsel %vm380_vm2, %v527_v33, 0  ;;  %1014 = vmatmul.mubr.msk.bf16.vlgmr.msra.gmra.mxu1 %vm380_vm2, %v1435_v11 }
 0x191   : > { %1024 = vmatpush3.bf16.xpose.msra.mxu1 %v532_v34  ;;  %1025 = vmatprep.mubr.msk.bf16.mxu1 %vm1268_vm0, %v1267_v0 }
 0x192   : > { %1035 = vmatprep.subr.bf16.mxu1 %v1267_v0 }
 0x194   : > { %1020 = vmatmul.mubr.msk.bf16.vlgmr.msra.gmra.mxu0 %vm380_vm2, %v1439_v18 }
 0x195   : > { %1031 = vmatprep.mubr.msk.bf16.mxu0 %vm1268_vm0, %v1267_v0 }
 0x198   : > { %1026 = vmatmul.mubr.msk.bf16.vlgmr.msra.gmra.mxu1 %vm380_vm2, %v1441_v21 }
 0x199   : > { %1037 = vmatprep.mubr.msk.bf16.mxu1 %vm1268_vm0, %v1267_v0 }
 0x24c   : > { %v421_v35 = vpop.f32.mrf.mxu0 }
 0x24d   : > { %v574_v36 = vsel %vm380_vm2, %v421_v35, -inf }
 0x24e   : > { %575 = vmax.xlane.f32.xlu0 %v574_v36  ;;  %v1009_v37 = vpop.f32.mrf.mxu0 }
 0x250   : > { %v424_v38 = vpop.f32.mrf.mxu0  ;;  %v470_v39 = vpop.f32.mrf.mxu1 }
 0x251   : > { %v577_v40 = vsel %vm380_vm2, %v470_v39, -inf }
 0x252   : > { %v1015_v41 = vpop.f32.mrf.mxu1  ;;  %578 = vmax.xlane.f32.xlu1 %v577_v40  ;;  %v1010_v42 = vpop.f32.mrf.mxu0 }
 0x254   : > { %v473_v43 = vpop.f32.mrf.mxu1  ;;  %v519_v44 = vpop.f32.mrf.mxu0 }
 0x255   : > { %v580_v45 = vsel %vm380_vm2, %v519_v44, -inf }
 0x256   : > { %v1016_v46 = vpop.f32.mrf.mxu1  ;;  %581 = vmax.xlane.f32.xlu0 %v580_v45  ;;  %v1021_v47 = vpop.f32.mrf.mxu0 }
 0x258   : > { %v522_v48 = vpop.f32.mrf.mxu0  ;;  %v568_v49 = vpop.f32.mrf.mxu1 }
 0x259   : > { %v583_v50 = vsel %vm380_vm2, %v568_v49, -inf }
 0x25a   : > { %v1027_v51 = vpop.f32.mrf.mxu1  ;;  %584 = vmax.xlane.f32.xlu0 %v583_v50  ;;  %v1022_v52 = vpop.f32.mrf.mxu0 }
 0x25c   : > { %v571_v53 = vpop.f32.mrf.mxu1 }
 0x25e   : > { %v1028_v54 = vpop.f32.mrf.mxu1 }
 0x263   : > { %622 = vrot.lane.b32.xlu1 %v1433_v8, %s1270_s17 }
 0x2d7   : > { %v576_v55 = vpop.xlane.xlu0 %575 }
 0x2d8   : > { %v586_v56 = vsub.f32 %v421_v35, %v576_v55 }
 0x2da   : > { %v590_v57 = vmul.f32 1.442695, %v586_v56 }
 0x2db   : > { %v579_v58 = vpop.xlane.xlu1 %578 }
 0x2dc   : > { %1123 = vpow2.f32 %v590_v57  ;;  %v587_v59 = vsub.f32 %v470_v39, %v579_v58 }
 0x2de   : > { %v592_v60 = vmul.f32 1.442695, %v587_v59 }
 0x2df   : > { %v623_v61 = vpop.permute.xlu1 %622  ;;  %v582_v62 = vpop.xlane.xlu0 %581 }
 0x2e0   : > { %1125 = vpow2.f32 %v592_v60  ;;  %v629_v63 = vsel %vm627_vm3, %v623_v61, 0  ;;  %v588_v1 = vsub.f32 %v519_v44, %v582_v62 }
 0x2e1   : > { %1030 = vmatpush3.bf16.msra.mxu0 %v629_v63 }
 0x2e2   : > { %v594_v2 = vmul.f32 1.442695, %v588_v1  ;;  %1041 = vmatprep.subr.bf16.mxu0 %v1267_v0 }
 0x2e3   : > { %v585_v3 = vpop.xlane.xlu0 %584 }
 0x2e4   : > { %1127 = vpow2.f32 %v594_v2  ;;  %v589_v4 = vsub.f32 %v568_v49, %v585_v3 }
 0x2e6   : > { %v596_v5 = vmul.f32 1.442695, %v589_v4 }
 0x2e8   : > { %1129 = vpow2.f32 %v596_v5 }
 0x2e9   : > { %v1124_v6 = vpop.eup %1123 }
 0x2ea   : > { %v598_v7 = vsel %vm380_vm2, %v1124_v6, 0.0 }
 0x2eb   : > { %599 = vadd.xlane.f32.xlu1 %v598_v7 }
 0x2ed   : > { %v1126_v8 = vpop.eup %1125 }
 0x2ee   : > { %v601_v9 = vsel %vm380_vm2, %v1126_v8, 0.0 }
 0x2ef   : > { %602 = vadd.xlane.f32.xlu0 %v601_v9 }
 0x2f1   : > { %v1128_v10 = vpop.eup %1127 }
 0x2f2   : > { %v604_v12 = vsel %vm380_vm2, %v1128_v10, 0.0 }
 0x2f3   : > { %605 = vadd.xlane.f32.xlu1 %v604_v12 }
 0x2f5   : > { %v1130_v13 = vpop.eup %1129 }
 0x2f6   : > { %v607_v14 = vsel %vm380_vm2, %v1130_v13, 0.0 }
 0x2f7   : > { %608 = vadd.xlane.f32.xlu0 %v607_v14 }
 0x304   : > { %719 = vrot.lane.b32.xlu1 %v1439_v18, %s1270_s17 }
 0x308   : > { %767 = vrot.lane.b32.xlu1 %v1441_v21, %s1270_s17 }
 0x30d   : > { %671 = vrot.lane.b32.xlu0 %v1435_v11, %s1270_s17 }
 0x374   : > { %v600_v15 = vpop.xlane.xlu1 %599 }
 0x375   : > { %1131 = vrcp.f32 %v600_v15 }
 0x378   : > { %v603_v16 = vpop.xlane.xlu0 %602 }
 0x379   : > { %1133 = vrcp.f32 %v603_v16 }
 0x37c   : > { %v606_v17 = vpop.xlane.xlu1 %605 }
 0x37d   : > { %1135 = vrcp.f32 %v606_v17 }
 0x380   : > { %v609_v19 = vpop.xlane.xlu0 %608  ;;  %v720_v22 = vpop.permute.xlu1 %719 }
 0x381   : > { %1137 = vrcp.f32 %v609_v19  ;;  %v725_v21 = vsel %vm627_vm3, %v720_v22, 0 }
 0x382   : > { %v1132_v20 = vpop.eup %1131 }
 0x383   : > { %v614_v23 = vmul.f32 %v1132_v20, %v1124_v6 }
 0x384   : > { %v672_v24 = vpop.permute.xlu0 %671  ;;  %v768_v27 = vpop.permute.xlu1 %767 }
 0x385   : > { %v677_v18 = vsel %vm627_vm3, %v672_v24, 0  ;;  %v618_v25 = vpack.c.bf16 %v614_v23, %v614_v23  ;;  %v773_v30 = vsel %vm627_vm3, %v768_v27, 0 }
 0x386   : > { %v1134_v26 = vpop.eup %1133  ;;  %1036 = vmatpush3.bf16.msra.mxu1 %v677_v18 }
 0x387   : > { %1032 = vmatmul.mubr.msk.bf16.vlgmr.msra.gmra.mxu0 %vm380_vm2, %v618_v25  ;;  %1047 = vmatprep.subr.bf16.mxu1 %v1267_v0  ;;  %v615_v11 = vmul.f32 %v1134_v26, %v1126_v8 }
 0x388   : > { %1042 = vmatpush3.bf16.msra.mxu0 %v725_v21  ;;  %1043 = vmatprep.mubr.msk.bf16.mxu0 %vm1268_vm0, %v1267_v0 }
 0x389   : > { %v619_v28 = vpack.c.bf16 %v615_v11, %v615_v11 }
 0x38a   : > { %v1136_v29 = vpop.eup %1135 }
 0x38b   : > { %1038 = vmatmul.mubr.msk.bf16.vlgmr.msra.gmra.mxu1 %vm380_vm2, %v619_v28  ;;  %v616_v31 = vmul.f32 %v1136_v29, %v1128_v10 }
 0x38c   : > { %1048 = vmatpush3.bf16.msra.mxu1 %v773_v30  ;;  %1049 = vmatprep.mubr.msk.bf16.mxu1 %vm1268_vm0, %v1267_v0 }
 0x38d   : > { %v620_v32 = vpack.c.bf16 %v616_v31, %v616_v31 }
 0x38e   : > { %v1138_v33 = vpop.eup %1137 }
 0x38f   : > { %1044 = vmatmul.mubr.msk.bf16.vlgmr.msra.gmra.mxu0 %vm380_vm2, %v620_v32  ;;  %v617_v34 = vmul.f32 %v1138_v33, %v1130_v13 }
 0x391   : > { %v621_v35 = vpack.c.bf16 %v617_v34, %v617_v34 }
 0x393   : > { %1050 = vmatmul.mubr.msk.bf16.vlgmr.msra.gmra.mxu1 %vm380_vm2, %v621_v35 }
 0x447   : > { %v665_v36 = vpop.f32.mrf.mxu0 }
 0x449   : > { %v1033_v37 = vpop.f32.mrf.mxu0 }
 0x44b   : > { %v668_v38 = vpop.f32.mrf.mxu0  ;;  %v713_v39 = vpop.f32.mrf.mxu1 }
 0x44c   : > { %816 = vrot.lane.b32.xlu0 %v713_v39, %s1271_s8 }
 0x44d   : > { %v1034_v40 = vpop.f32.mrf.mxu0  ;;  %v1039_v41 = vpop.f32.mrf.mxu1 }
 0x44f   : > { %v716_v42 = vpop.f32.mrf.mxu1  ;;  %v761_v43 = vpop.f32.mrf.mxu0 }
 0x450   : > { %820 = vrot.lane.b32.xlu1 %v761_v43, %s1272_s18 }
 0x451   : > { %v1040_v0 = vpop.f32.mrf.mxu1  ;;  %v1045_v44 = vpop.f32.mrf.mxu0 }
 0x453   : > { %v764_v45 = vpop.f32.mrf.mxu0  ;;  %v809_v46 = vpop.f32.mrf.mxu1 }
 0x454   : > { %824 = vrot.lane.b32.xlu0 %v809_v46, %s1273_s19 }
 0x455   : > { %v1046_v47 = vpop.f32.mrf.mxu0  ;;  %v1051_v48 = vpop.f32.mrf.mxu1 }
 0x457   : > { %v812_v49 = vpop.f32.mrf.mxu1 }
 0x459   : > { %v1052_v50 = vpop.f32.mrf.mxu1 }
 0x4be   : > { %v817_v51 = vpop.permute.xlu0 %816 }
 0x4bf   : > { %v827_v53 = vsel %vm380_vm2, %v665_v36, %v817_v51 }
 0x4c2   : > { %v821_v52 = vpop.permute.xlu1 %820 }
 0x4c3   : > { %v828_v54 = vsel %vm191_vm1, %v827_v53, %v821_v52 }
 0x4c6   : > { %v825_v55 = vpop.permute.xlu0 %824 }
 0x4c7   : > { %v830_v56 = vsel %vm829_vm4, %v828_v54, %v825_v55 }
 0x4c8   : > { %832 = vst.msk [vmem:[%s173_s23] sm:$0xff] %vm831_vm5, %v830_v56 }
 0x4c9   : > { %1206 = shalt.err (!%p1203_p0)
}
 0x4ca   : > { %s1207_s7 = scalar_lea.hbm %s1507_s27, 128  ;;  %s1211_s22 = scalar_lea.hbm %s1546_s2, 256 }
 0x4cb   : > { %p1208_p5 = scmp.ne.s32.totalorder %s1507_s27, %s1207_s7  ;;  %p1212_p1 = scmp.lt.s32.totalorder %s1507_s27, %s1546_s2 }
 0x4cc   : > { %p1213_p4 = scmp.lt.s32.totalorder %s1211_s22, %s1207_s7 }
 0x4cd   : > { %p1209_p9 = pnand %p1208_p5, %p1562_p3 }
 0x4ce   : > { %p1214_p6 = por %p1213_p4, %p1212_p1 }
 0x4cf   : > { %p1210_p12 = pneg %p1209_p9 }
 0x4d1   : > { %p1215_p8 = pnand %p1214_p6, %p1210_p12 }
 0x4d3   : > { %1218 = shalt.err (!%p1215_p8)
}
 0x4d4   : > { %1059 = dma.vmem_to_hbm [thread:$0]  (%p1562_p3), %s848_s24, 128, %s1507_s27, %s834_s28  }
 0x4d5 PF: > { %s859_s8 = sand.u32 1, %s1249_s9   ;;  %p1563_p11 = scmp.ne.s32.totalorder %s1552_s16, 0 }
 0x4d6   : > { %p1564_p7 = scmp.ge.s32.totalorder %s1261_s12, 2  ;;  %s860_s18 = scalar_lea.sflag [#allocation4], %s859_s8 }
 0x4d8   : > { %p1070_p10 = pnand %p1564_p7, %p1563_p11 }
 0x4da   : > { %p1071_p2 = pneg %p1070_p10 }
 0x4dc   : > { %1244 = dma.done.wait (%p1071_p2), %s860_s18, 128  }
 0x4dd   : > { %1246 = vsyncadd (%p1071_p2), %s860_s18, 4294967168  ;;  %p16_p13 = scmp.ge.s32.totalorder %s1344_s21, 4   ;;  %s1565_s9 = smov %s1253_s10 }
 0x4de   : > { %s1566_s10 = smov %s1257_s11  ;;  %s1567_s11 = smov %s1361_s29 }
 0x4df   : > { %s1568_s12 = smov %s1344_s21  ;;  %18 = sbr.rel (!%p16_p13) target bundleno = 6 (0x6), region = 77 }
 0x4e4   :  { %865 = vsyncpa [#allocation3], 1 }
 0x4e5   :  { %867 = vsyncpa [#allocation3 + $0x1], 1 }
 0x4e6   :  { %868 = vsyncpa [#allocation6], 1 }
 0x4e7   :  { %869 = vsyncpa [#allocation4], 1 }
 0x4e8   :  { %871 = vsyncpa [#allocation4 + $0x1], 1 }

</bundles_post_ra>
